<compile_context>
chip_gen: v7x
topology: tpu7x:2x2x1
jax: 0.10.0
libtpu: 0.0.40
codegen_flags: <defaults>
</compile_context>

<pallas_src>
import jax
import jax.numpy as jnp
from jax.experimental import pallas as pl
from jax.experimental.pallas import tpu as pltpu

_SQRT1_2 = 0.7071067811865476


# ----------------------------------------------------------------------------
# In-kernel math helpers (only exp/abs/where -> guaranteed Mosaic lowering).
# ----------------------------------------------------------------------------
def _erf(x):
    # Abramowitz & Stegun 7.1.26, max abs error ~1.5e-7 (below f32 noise), so
    # PyTorch's exact (erf-based) nn.GELU semantics are reproduced.
    p = 0.3275911
    a1, a2, a3, a4, a5 = (0.254829592, -0.284496736, 1.421413741,
                          -1.453152027, 1.061405429)
    ax = jnp.abs(x)
    t = 1.0 / (1.0 + p * ax)
    poly = ((((a5 * t + a4) * t + a3) * t + a2) * t + a1) * t
    y = 1.0 - poly * jnp.exp(-ax * ax)
    return jnp.where(x >= 0, y, -y)


def _gelu(x):
    return 0.5 * x * (1.0 + _erf(x * _SQRT1_2))


def _sigmoid(x):
    return 1.0 / (1.0 + jnp.exp(-x))


def _excite(w_ref, xt, xf):
    """Squeeze (per-row mean over T) + 2->1->2 excitation, all in f32.

    xt/xf: (TB, T) f32. Returns per-row gates g0, g1 of shape (TB, 1).
    All math is row-independent, so padding rows of a ragged last block
    cannot contaminate valid rows.
    """
    st = jnp.mean(xt, axis=1, keepdims=True)          # (TB, 1)
    sf = jnp.mean(xf, axis=1, keepdims=True)          # (TB, 1)
    h = _gelu(w_ref[0] * st + w_ref[1] * sf)          # fc1 (2->1), GELU
    g0 = _sigmoid(w_ref[2] * h)                       # fc2 row 0, sigmoid
    g1 = _sigmoid(w_ref[3] * h)                       # fc2 row 1, sigmoid
    return g0, g1


# ----------------------------------------------------------------------------
# Kernels
#   w_ref  : SMEM (4,) f32 = [fc1_w[0,0], fc1_w[0,1], fc2_w[0,0], fc2_w[1,0]]
#   xt_ref : VMEM (TB, T)   time-branch rows (native dtype)
#   xf_ref : VMEM (TB, T)   freq-branch rows (native dtype)
# ----------------------------------------------------------------------------
def _se_fuse_kernel(w_ref, xt_ref, xf_ref, out_ref):
    xt = xt_ref[...].astype(jnp.float32)
    xf = xf_ref[...].astype(jnp.float32)
    g0, g1 = _excite(w_ref, xt, xf)
    # fuse: (x * w).sum(dim=1, keepdim=True) -> one full-block store
    out_ref[...] = (g0 * xt + g1 * xf).astype(out_ref.dtype)


def _se_weight_kernel(w_ref, xt_ref, xf_ref, wgt_ref):
    xt = xt_ref[...].astype(jnp.float32)
    xf = xf_ref[...].astype(jnp.float32)
    g0, g1 = _excite(w_ref, xt, xf)
    # single (TB, 2) store; no fused slab is computed/stored on this path
    wgt_ref[...] = jnp.concatenate([g0, g1], axis=1).astype(wgt_ref.dtype)


# ----------------------------------------------------------------------------
# Wrapper
# ----------------------------------------------------------------------------
def _pick_block_rows(B, T, itemsize):
    """Rows per grid step: keep ~2 inputs + 1 output, double-buffered, ~8 MiB."""
    align = max(8, 32 // itemsize)            # sublane tile: 8 f32 / 16 bf16
    budget = 8 << 20
    tb = budget // max(1, 6 * T * itemsize)
    tb = min(max(tb, align), 1024)
    tb -= tb % align
    tb = max(tb, align)
    if B <= tb:
        return B                              # one block = whole (small) batch
    return tb


def se_fusion_forward(fc1_w, fc2_w, xt, xf, *, return_weight=False):
    """SEFusion forward.

    fc1_w: (1, 2)   fc2_w: (2, 1)   xt, xf: (B, 1, T, 1)
    Returns (B, 1, T, 1) fused features, or (B, 2, 1, 1) gates if
    return_weight=True.  Output dtype follows the input dtype.
    """
    B, _, T, _ = xt.shape
    out_dtype = jnp.result_type(xt.dtype, xf.dtype)
    itemsize = jnp.dtype(out_dtype).itemsize

    # Metadata-only squeeze of the two size-1 dims; native dtype kept.
    xt2 = xt.reshape(B, T)
    xf2 = xf.reshape(B, T)

    # Four excitation scalars -> one flat f32 SMEM vector.
    w_flat = jnp.concatenate(
        [fc1_w.reshape(-1), fc2_w.reshape(-1)]).astype(jnp.float32)

    tb = _pick_block_rows(B, T, itemsize)
    grid = (pl.cdiv(B, tb),)

    # Raise the scoped-VMEM limit only when long rows need it (stay well
    # under v7x's 64 MiB physical VMEM).
    est_bytes = 6 * tb * T * itemsize
    cp_kwargs = dict(dimension_semantics=("parallel",))
    if est_bytes > (12 << 20):
        cp_kwargs["vmem_limit_bytes"] = int(min(est_bytes + (8 << 20), 48 << 20))
    cp = pltpu.CompilerParams(**cp_kwargs)

    in_specs = [
        pl.BlockSpec(memory_space=pltpu.MemorySpace.SMEM),   # fc scalars
        pl.BlockSpec((tb, T), lambda i: (i, 0)),             # xt rows
        pl.BlockSpec((tb, T), lambda i: (i, 0)),             # xf rows
    ]

    if return_weight:
        # Gate-only path: no (B, T) fused output at all.
        wgt = pl.pallas_call(
            _se_weight_kernel,
            grid=grid,
            in_specs=in_specs,
            out_specs=pl.BlockSpec((tb, 2), lambda i: (i, 0)),
            out_shape=jax.ShapeDtypeStruct((B, 2), out_dtype),
            compiler_params=cp,
        )(w_flat, xt2, xf2)
        return wgt.reshape(B, 2, 1, 1)

    fused = pl.pallas_call(
        _se_fuse_kernel,
        grid=grid,
        in_specs=in_specs,
        out_specs=pl.BlockSpec((tb, T), lambda i: (i, 0)),
        out_shape=jax.ShapeDtypeStruct((B, T), out_dtype),
        compiler_params=cp,
    )(w_flat, xt2, xf2)
    return fused.reshape(B, 1, T, 1)


# ----------------------------------------------------------------------------
# Pure-JAX reference (mirrors the PyTorch module) for a correctness check.
# ----------------------------------------------------------------------------
def se_fusion_reference(fc1_w, fc2_w, xt, xf, *, return_weight=False):
    x = jnp.concatenate([xt, xf], axis=1)              # (B, 2, T, 1)
    s = x.mean(axis=(2, 3))                            # (B, 2)
    h = jax.nn.gelu(s @ fc1_w.T, approximate=False)    # (B, 1)
    w = jax.nn.sigmoid(h @ fc2_w.T).reshape(-1, 2, 1, 1)
    if return_weight:
        return w
    return (x * w).sum(axis=1, keepdims=True)          # (B, 1, T, 1)


if __name__ == "__main__":
    B, T = 4, 16
    key = jax.random.PRNGKey(0)
    k1, k2, k3, k4 = jax.random.split(key, 4)

    fc1_w = 0.5 * jax.random.normal(k1, (1, 2), jnp.float32)   # Linear(2,1,no bias)
    fc2_w = 0.5 * jax.random.normal(k2, (2, 1), jnp.float32)   # Linear(1,2,no bias)
    xt = jax.random.normal(k3, (B, 1, T, 1), jnp.float32)
    xf = jax.random.normal(k4, (B, 1, T, 1), jnp.float32)

    out = jax.block_until_ready(se_fusion_forward(fc1_w, fc2_w, xt, xf))
    wgt = jax.block_until_ready(
        se_fusion_forward(fc1_w, fc2_w, xt, xf, return_weight=True))

    assert out.shape == (B, 1, T, 1), out.shape
    assert out.dtype == xt.dtype, out.dtype
    assert wgt.shape == (B, 2, 1, 1), wgt.shape
    assert bool(jnp.all(jnp.isfinite(out)))

    ref_out = se_fusion_reference(fc1_w, fc2_w, xt, xf)
    ref_wgt = se_fusion_reference(fc1_w, fc2_w, xt, xf, return_weight=True)
    assert bool(jnp.allclose(out, ref_out, rtol=2e-5, atol=2e-5))
    assert bool(jnp.allclose(wgt, ref_wgt, rtol=2e-5, atol=2e-5))

    # bf16 smoke test: native dtype flows through the kernel (no wrapper cast).
    out_b = jax.block_until_ready(
        se_fusion_forward(fc1_w.astype(jnp.bfloat16), fc2_w.astype(jnp.bfloat16),
                          xt.astype(jnp.bfloat16), xf.astype(jnp.bfloat16)))
    assert out_b.shape == (B, 1, T, 1) and out_b.dtype == jnp.bfloat16
    assert bool(jnp.allclose(out_b.astype(jnp.float32), ref_out,
                             rtol=5e-2, atol=5e-2))

    print("KERNEL_OK")
</pallas_src>

<mosaic_0001>
module attributes {stable_mosaic.version = 11 : i64} {
  func.func @_se_fuse_kernel(%arg0: i32, %arg1: memref<4xf32, #tpu.memory_space<smem>>, %arg2: memref<4x16xf32, #tpu.memory_space<vmem>>, %arg3: memref<4x16xf32, #tpu.memory_space<vmem>>, %arg4: memref<4x16xf32, #tpu.memory_space<vmem>>) attributes {dimension_semantics = [#tpu.dimension_semantics<parallel>], iteration_bounds = array<i64: 1>, scalar_prefetch = 0 : i64, scratch_operands = 0 : i64, tpu.core_type = #tpu.core_type<tc>, window_params = [{transform_indices = @transform_0, window_bounds = array<i64: 4>}, {transform_indices = @transform_1, window_bounds = array<i64: 4, 16>}, {transform_indices = @transform_2, window_bounds = array<i64: 4, 16>}, {transform_indices = @transform_3, window_bounds = array<i64: 4, 16>}]} {
    %c0 = arith.constant 0 : index
    %c0_0 = arith.constant 0 : index
    %0 = vector.load %arg2[%c0, %c0_0] : memref<4x16xf32, #tpu.memory_space<vmem>>, vector<4x16xf32>
    %c0_1 = arith.constant 0 : index
    %c0_2 = arith.constant 0 : index
    %1 = vector.load %arg3[%c0_1, %c0_2] : memref<4x16xf32, #tpu.memory_space<vmem>>, vector<4x16xf32>
    %cst = arith.constant dense<0.000000e+00> : vector<4xf32>
    %2 = vector.multi_reduction <add>, %0, %cst [1] : vector<4x16xf32> to vector<4xf32>
    %3 = vector.shape_cast %2 : vector<4xf32> to vector<4x1xf32>
    %cst_3 = arith.constant 1.600000e+01 : f32
    %4 = vector.broadcast %cst_3 : f32 to vector<4x1xf32>
    %5 = arith.divf %3, %4 : vector<4x1xf32>
    %cst_4 = arith.constant dense<0.000000e+00> : vector<4xf32>
    %6 = vector.multi_reduction <add>, %1, %cst_4 [1] : vector<4x16xf32> to vector<4xf32>
    %7 = vector.shape_cast %6 : vector<4xf32> to vector<4x1xf32>
    %cst_5 = arith.constant 1.600000e+01 : f32
    %8 = vector.broadcast %cst_5 : f32 to vector<4x1xf32>
    %9 = arith.divf %7, %8 : vector<4x1xf32>
    %c0_6 = arith.constant 0 : index
    %10 = memref.load %arg1[%c0_6] : memref<4xf32, #tpu.memory_space<smem>>
    %11 = vector.broadcast %10 : f32 to vector<4x1xf32>
    %12 = arith.mulf %11, %5 : vector<4x1xf32>
    %c1 = arith.constant 1 : index
    %13 = memref.load %arg1[%c1] : memref<4xf32, #tpu.memory_space<smem>>
    %14 = vector.broadcast %13 : f32 to vector<4x1xf32>
    %15 = arith.mulf %14, %9 : vector<4x1xf32>
    %16 = arith.addf %12, %15 : vector<4x1xf32>
    %cst_7 = arith.constant 5.000000e-01 : f32
    %17 = vector.broadcast %cst_7 : f32 to vector<4x1xf32>
    %18 = arith.mulf %17, %16 : vector<4x1xf32>
    %cst_8 = arith.constant 0.707106769 : f32
    %19 = vector.broadcast %cst_8 : f32 to vector<4x1xf32>
    %20 = arith.mulf %16, %19 : vector<4x1xf32>
    %21 = math.absf %20 : vector<4x1xf32>
    %cst_9 = arith.constant 0.327591091 : f32
    %22 = vector.broadcast %cst_9 : f32 to vector<4x1xf32>
    %23 = arith.mulf %22, %21 : vector<4x1xf32>
    %cst_10 = arith.constant 1.000000e+00 : f32
    %24 = vector.broadcast %cst_10 : f32 to vector<4x1xf32>
    %25 = arith.addf %24, %23 : vector<4x1xf32>
    %cst_11 = arith.constant 1.000000e+00 : f32
    %26 = vector.broadcast %cst_11 : f32 to vector<4x1xf32>
    %27 = arith.divf %26, %25 : vector<4x1xf32>
    %cst_12 = arith.constant 1.06140542 : f32
    %28 = vector.broadcast %cst_12 : f32 to vector<4x1xf32>
    %29 = arith.mulf %28, %27 : vector<4x1xf32>
    %cst_13 = arith.constant -1.45315206 : f32
    %30 = vector.broadcast %cst_13 : f32 to vector<4x1xf32>
    %31 = arith.addf %29, %30 : vector<4x1xf32>
    %32 = arith.mulf %31, %27 : vector<4x1xf32>
    %cst_14 = arith.constant 1.42141378 : f32
    %33 = vector.broadcast %cst_14 : f32 to vector<4x1xf32>
    %34 = arith.addf %32, %33 : vector<4x1xf32>
    %35 = arith.mulf %34, %27 : vector<4x1xf32>
    %cst_15 = arith.constant -0.284496725 : f32
    %36 = vector.broadcast %cst_15 : f32 to vector<4x1xf32>
    %37 = arith.addf %35, %36 : vector<4x1xf32>
    %38 = arith.mulf %37, %27 : vector<4x1xf32>
    %cst_16 = arith.constant 0.254829586 : f32
    %39 = vector.broadcast %cst_16 : f32 to vector<4x1xf32>
    %40 = arith.addf %38, %39 : vector<4x1xf32>
    %41 = arith.mulf %40, %27 : vector<4x1xf32>
    %cst_17 = arith.constant 0.000000e+00 : f32
    %42 = vector.broadcast %cst_17 : f32 to vector<4x1xf32>
    %43 = arith.subf %42, %21 : vector<4x1xf32>
    %44 = arith.mulf %43, %21 : vector<4x1xf32>
    %45 = math.exp %44 : vector<4x1xf32>
    %46 = arith.mulf %41, %45 : vector<4x1xf32>
    %cst_18 = arith.constant 1.000000e+00 : f32
    %47 = vector.broadcast %cst_18 : f32 to vector<4x1xf32>
    %48 = arith.subf %47, %46 : vector<4x1xf32>
    %cst_19 = arith.constant 0.000000e+00 : f32
    %49 = vector.broadcast %cst_19 : f32 to vector<4x1xf32>
    %50 = arith.cmpf oge, %20, %49 : vector<4x1xf32>
    %cst_20 = arith.constant 0.000000e+00 : f32
    %51 = vector.broadcast %cst_20 : f32 to vector<4x1xf32>
    %52 = arith.subf %51, %48 : vector<4x1xf32>
    %53 = arith.select %50, %48, %52 : vector<4x1xi1>, vector<4x1xf32>
    %cst_21 = arith.constant 1.000000e+00 : f32
    %54 = vector.broadcast %cst_21 : f32 to vector<4x1xf32>
    %55 = arith.addf %54, %53 : vector<4x1xf32>
    %56 = arith.mulf %18, %55 : vector<4x1xf32>
    %c2 = arith.constant 2 : index
    %57 = memref.load %arg1[%c2] : memref<4xf32, #tpu.memory_space<smem>>
    %58 = vector.broadcast %57 : f32 to vector<4x1xf32>
    %59 = arith.mulf %58, %56 : vector<4x1xf32>
    %cst_22 = arith.constant 0.000000e+00 : f32
    %60 = vector.broadcast %cst_22 : f32 to vector<4x1xf32>
    %61 = arith.subf %60, %59 : vector<4x1xf32>
    %62 = math.exp %61 : vector<4x1xf32>
    %cst_23 = arith.constant 1.000000e+00 : f32
    %63 = vector.broadcast %cst_23 : f32 to vector<4x1xf32>
    %64 = arith.addf %63, %62 : vector<4x1xf32>
    %cst_24 = arith.constant 1.000000e+00 : f32
    %65 = vector.broadcast %cst_24 : f32 to vector<4x1xf32>
    %66 = arith.divf %65, %64 : vector<4x1xf32>
    %c3 = arith.constant 3 : index
    %67 = memref.load %arg1[%c3] : memref<4xf32, #tpu.memory_space<smem>>
    %68 = vector.broadcast %67 : f32 to vector<4x1xf32>
    %69 = arith.mulf %68, %56 : vector<4x1xf32>
    %cst_25 = arith.constant 0.000000e+00 : f32
    %70 = vector.broadcast %cst_25 : f32 to vector<4x1xf32>
    %71 = arith.subf %70, %69 : vector<4x1xf32>
    %72 = math.exp %71 : vector<4x1xf32>
    %cst_26 = arith.constant 1.000000e+00 : f32
    %73 = vector.broadcast %cst_26 : f32 to vector<4x1xf32>
    %74 = arith.addf %73, %72 : vector<4x1xf32>
    %cst_27 = arith.constant 1.000000e+00 : f32
    %75 = vector.broadcast %cst_27 : f32 to vector<4x1xf32>
    %76 = arith.divf %75, %74 : vector<4x1xf32>
    %77 = vector.broadcast %66 : vector<4x1xf32> to vector<4x16xf32>
    %78 = arith.mulf %77, %0 : vector<4x16xf32>
    %79 = vector.broadcast %76 : vector<4x1xf32> to vector<4x16xf32>
    %80 = arith.mulf %79, %1 : vector<4x16xf32>
    %81 = arith.addf %78, %80 : vector<4x16xf32>
    %c0_28 = arith.constant 0 : index
    %c0_29 = arith.constant 0 : index
    %82 = vector.load %arg4[%c0_28, %c0_29] : memref<4x16xf32, #tpu.memory_space<vmem>>, vector<4x16xf32>
    tpu.vector_store %arg4[%c0_28, %c0_29], %81 {strides = array<i32>} : memref<4x16xf32, #tpu.memory_space<vmem>>, vector<4x16xf32>,
    return
  }
  func.func @transform_0(%arg0: i32) -> i32 {
    %c0_i32 = arith.constant 0 : i32
    %c0_i32_0 = arith.constant 0 : i32
    return %c0_i32 : i32
  }
  func.func @transform_1(%arg0: i32) -> (i32, i32) {
    %c0_i32 = arith.constant 0 : i32
    %c0_i32_0 = arith.constant 0 : i32
    return %arg0, %c0_i32 : i32, i32
  }
  func.func @transform_2(%arg0: i32) -> (i32, i32) {
    %c0_i32 = arith.constant 0 : i32
    %c0_i32_0 = arith.constant 0 : i32
    return %arg0, %c0_i32 : i32, i32
  }
  func.func @transform_3(%arg0: i32) -> (i32, i32) {
    %c0_i32 = arith.constant 0 : i32
    %c0_i32_0 = arith.constant 0 : i32
    return %arg0, %c0_i32 : i32, i32
  }
}

</mosaic_0001>

<bundles_post_ra>
// kernel: tpu_custom_call.1
= control target key start
LH: loop header
LB: loop body
LE: loop exit
PB: predicated region body
PF: predicated region fallthrough
CT: control target
= control target key end

     0   :  { %8 = vsyncpa [#allocation5], 0  ;;  %s273_s0 = inlined_call_operand.hbm [shape: f32[4], index: 0, kind: input, shape index: {}]   ;;  %s274_s1 = inlined_call_operand.hbm [shape: f32[4,16], index: 1, kind: input, shape index: {}]   ;;  %s275_s2 = inlined_call_operand.vmem [shape: f32[4,16], index: 2, kind: input, shape index: {}]   ;;  %s276_s3 = inlined_call_operand.hbm [shape: f32[4,16], index: 3, kind: output, shape index: {}]  }
   0x1   :  { %9 = vsyncpa [#allocation3], 0 }
   0x2   :  { %10 = vsyncpa [#allocation4], 0  ;;  %s140_s14 = scalar_lea.hbm %s273_s0, 16 }
   0x3   :  { %p141_p0 = scmp.ne.s32.totalorder %s273_s0, %s140_s14  ;;  %p144_p1 = scmp.lt.u32.totalorder %s140_s14, %s273_s0 }
   0x5   :  { %p146_p2 = pnand %p144_p1, %p141_p0 }
   0x7   :  { %149 = shalt.err (!%p146_p2)
}
   0x8   :  { %s200_s19 = smov [#allocation2]   ;;  %s201_s22 = smov [#allocation6]  }
   0x9   :  { %18 = dma.hbm_to_smem %s273_s0, 16, %s200_s19, [#allocation5]  }
   0xa   :  { %s25_s23 = sshll.u32 %s201_s22, 4  ;;  %s150_s26 = scalar_lea.hbm %s274_s1, 64  ;;  %s26_s23 = int_to_ptr.vmem [resolvable:$true] %s25_s23 }
   0xb   :  { %p151_p3 = scmp.ne.s32.totalorder %s274_s1, %s150_s26  ;;  %p154_p4 = scmp.lt.u32.totalorder %s150_s26, %s274_s1 }
   0xd   :  { %p156_p5 = pnand %p154_p4, %p151_p3 }
   0xf   :  { %159 = shalt.err (!%p156_p5)
}
  0x10   :  { %s160_s4 = scalar_lea.vmem %s26_s23, 64  ;;  %p165_p7 = scmp.lt.s32.totalorder %s26_s23, %s26_s23 }
  0x11   :  { %p161_p6 = scmp.ne.s32.totalorder %s26_s23, %s160_s4  ;;  %p166_p8 = scmp.lt.s32.totalorder %s160_s4, %s160_s4 }
  0x13   :  { %p167_p9 = por %p166_p8, %p165_p7 }
  0x15   :  { %p168_p10 = pnand %p167_p9, %p161_p6 }
  0x17   :  { %171 = shalt.err (!%p168_p10)
}
  0x18   :  { %28 = dma.hbm_to_vmem [thread:$0]  %s274_s1, 64, %s26_s23, [#allocation3]  }
  0x19   :  { %194 = dma.done.wait [#allocation5], 16  }
  0x1a   :  { %195 = vsyncadd [#allocation5], 4294967280 }
  0x1b   :  { %196 = dma.done.wait [#allocation3], 64  }
  0x1c   :  { %197 = vsyncadd [#allocation3], 4294967232 }
  0x1d   :  { %37 = sfence }
  0x1e   :  { %v247_v0 = vld [vmem:[#allocation6] sm:$0xf]  ;;  %vm40_vm0 = vcmask 125952   ;;  %v252_v1 = vld [vmem:[%s275_s2] sm:$0xf]  ;;  %s50_s1 = sld [smem:[#allocation2]] }
  0x1f   :  { %v41_v2 = vsel %vm40_vm0, %v247_v0, 0.0  ;;  %v46_v3 = vsel %vm40_vm0, %v252_v1, 0.0  ;;  %s122_s8 = sld [smem:[#allocation2 + $0x1]]  ;;  %s123_s2 = sld [smem:[#allocation2 + $0x2]] }
  0x20   :  { %42 = vadd.xlane.f32.xlu0 %v41_v2  ;;  %s124_s9 = sld [smem:[#allocation2 + $0x3]]  ;;  %s202_s10 = smov [#allocation7]  }
  0x21   :  { %s112_s11 = sshll.u32 %s202_s10, 4  ;;  %s113_s11 = int_to_ptr.vmem [resolvable:$true] %s112_s11 }
  0x22   :  { %s172_s12 = scalar_lea.vmem %s113_s11, 64  ;;  %p177_p12 = scmp.lt.s32.totalorder %s113_s11, %s113_s11 }
  0x23   :  { %p173_p11 = scmp.ne.s32.totalorder %s113_s11, %s172_s12  ;;  %p178_p13 = scmp.lt.s32.totalorder %s172_s12, %s172_s12 }
  0x24   :  { %47 = vadd.xlane.f32.xlu0 %v46_v3  ;;  %v51_v6 = vstv %s50_s1 }
  0x25   :  { %v54_v7 = vstv %s122_s8  ;;  %v85_v37 = vstv %s123_s2  ;;  %p179_p0 = por %p178_p13, %p177_p12 }
  0x26   :  { %v94_v38 = vstv %s124_s9 }
  0x27   :  { %p180_p1 = pnand %p179_p0, %p173_p11 }
  0xad   :  { %v43_v4 = vpop.xlane.xlu0 %42 }
  0xae   :  { %v45_v5 = vmul.f32 0.0625, %v43_v4 }
  0xb0   :  { %v52_v10 = vmul.f32 %v51_v6, %v45_v5 }
  0xb1   :  { %v48_v8 = vpop.xlane.xlu0 %47 }
  0xb2   :  { %v49_v9 = vmul.f32 0.0625, %v48_v8 }
  0xb4   :  { %v55_v11 = vmul.f32 %v54_v7, %v49_v9 }
  0xb6   :  { %v56_v12 = vadd.f32 %v55_v11, %v52_v10 }
  0xb8   :  { %v58_v13 = vmul.f32 0.70710677, %v56_v12  ;;  %v57_v35 = vmul.f32 0.5, %v56_v12 }
  0xba   :  { %v59_v14 = vand.u32 2147483647, %v58_v13  ;;  %vm79_vm1 = vcmp.ge.f32.partialorder %v58_v13, 0.0 }
  0xbc   :  { %v60_v15 = vmul.f32 0.3275911, %v59_v14  ;;  %v73_v17 = vsub.f32 0.0, %v59_v14 }
  0xbe   :  { %v61_v16 = vadd.f32 1.0, %v60_v15  ;;  %v74_v19 = vmul.f32 %v73_v17, %v59_v14 }
  0xc0   :  { %128 = vrcp.f32 %v61_v16  ;;  %v75_v22 = vmul.f32 1.442695, %v74_v19 }
  0xc2   :  { %130 = vpow2.f32 %v75_v22 }
  0xca   :  { %v129_v18 = vpop.eup %128 }
  0xcb   :  { %v64_v20 = vmul.f32 1.0614054, %v129_v18 }
  0xcc   :  { %v131_v30 = vpop.eup %130 }
  0xcd   :  { %v65_v21 = vadd.f32 -1.4531521, %v64_v20 }
  0xcf   :  { %v66_v23 = vmul.f32 %v129_v18, %v65_v21 }
  0xd1   :  { %v67_v24 = vadd.f32 1.4214138, %v66_v23 }
  0xd3   :  { %v68_v25 = vmul.f32 %v129_v18, %v67_v24 }
  0xd5   :  { %v69_v26 = vadd.f32 -0.28449672, %v68_v25 }
  0xd7   :  { %v70_v27 = vmul.f32 %v129_v18, %v69_v26 }
  0xd9   :  { %v71_v28 = vadd.f32 0.2548296, %v70_v27 }
  0xdb   :  { %v72_v29 = vmul.f32 %v129_v18, %v71_v28 }
  0xdd   :  { %v77_v31 = vmul.f32 %v131_v30, %v72_v29 }
  0xdf   :  { %v78_v32 = vsub.f32 1.0, %v77_v31 }
  0xe1   :  { %v80_v33 = vsub.f32 0.0, %v78_v32 }
  0xe3   :  { %v81_v34 = vsel %vm79_vm1, %v78_v32, %v80_v33 }
  0xe4   :  { %v82_v36 = vadd.f32 1.0, %v81_v34 }
  0xe6   :  { %v83_v39 = vmul.f32 %v82_v36, %v57_v35 }
  0xe8   :  { %v86_v40 = vmul.f32 %v85_v37, %v83_v39  ;;  %v95_v41 = vmul.f32 %v94_v38, %v83_v39 }
  0xea   :  { %v87_v42 = vsub.f32 0.0, %v86_v40  ;;  %v96_v43 = vsub.f32 0.0, %v95_v41 }
  0xec   :  { %v88_v44 = vmul.f32 1.442695, %v87_v42  ;;  %v97_v45 = vmul.f32 1.442695, %v96_v43 }
  0xee   :  { %132 = vpow2.f32 %v88_v44 }
  0xef   :  { %134 = vpow2.f32 %v97_v45 }
  0xf8   :  { %v133_v46 = vpop.eup %132 }
  0xf9   :  { %v135_v47 = vpop.eup %134  ;;  %v90_v48 = vadd.f32 1.0, %v133_v46 }
  0xfa   :  { %v99_v49 = vadd.f32 1.0, %v135_v47 }
  0xfb   :  { %136 = vrcp.f32 %v90_v48 }
  0xfc   :  { %138 = vrcp.f32 %v99_v49 }
 0x105   :  { %v137_v50 = vpop.eup %136 }
 0x106   :  { %v139_v51 = vpop.eup %138  ;;  %v102_v52 = vmul.f32 %v137_v50, %v247_v0 }
 0x107   :  { %v103_v53 = vmul.f32 %v139_v51, %v252_v1 }
 0x109   :  { %v104_v54 = vadd.f32 %v103_v53, %v102_v52 }
 0x10b   :  { %105 = vst.msk [vmem:[#allocation7] sm:$0xf] %vm40_vm0, %v104_v54 }
 0x10c   :  { %183 = shalt.err (!%p180_p1)
}
 0x10d   :  { %s184_s15 = scalar_lea.hbm %s276_s3, 64 }
 0x10e   :  { %p185_p2 = scmp.ne.s32.totalorder %s276_s3, %s184_s15  ;;  %p188_p3 = scmp.lt.u32.totalorder %s184_s15, %s276_s3 }
 0x110   :  { %p190_p4 = pnand %p188_p3, %p185_p2 }
 0x112   :  { %193 = shalt.err (!%p190_p4)
}
 0x113   :  { %115 = dma.vmem_to_hbm [thread:$0]  %s113_s11, 64, %s276_s3, [#allocation4]  }
 0x114   :  { %198 = dma.done.wait [#allocation4], 64  }
 0x115   :  { %199 = vsyncadd [#allocation4], 4294967232 }
 0x116   :  { %119 = vsyncpa [#allocation3], 1 }
 0x117   :  { %120 = vsyncpa [#allocation4], 1 }
 0x118   :  { %121 = vsyncpa [#allocation5], 1 }

</bundles_post_ra>
